<compile_context>
chip_gen: v5e
topology: v5e:2x2
jax: 0.10.0
libtpu: 0.0.40
codegen_flags: <defaults>
</compile_context>

<pallas_src>
import functools

import jax
import jax.numpy as jnp
from jax.experimental import pallas as pl
from jax.experimental.pallas import tpu as pltpu


def _sepconv_kernel(x_ref, dwf_ref, pw_ref, bias_ref, o_ref, acc_ref, *,
                    H, W, KH, KW, Cin, Cout, use_mxu):
    # x_ref:    (1, Cin, H*W)    input tile, spatial flattened onto the lane axis
    # dwf_ref:  (KH*KW, Cin, 1)  BN-folded depthwise tap weights
    # pw_ref:   (Cin, Cout[,1])  pointwise weights ((Cin,Cout,1) on the VPU path)
    # bias_ref: (Cout, 1)        folded BN bias routed through the pointwise conv
    # o_ref:    (1, Cout, H*W)   lane-dense output block
    # acc_ref:  (Cin, H*W) f32   VMEM scratch accumulator for the depthwise sum
    P = H * W
    pad_h = (KH - 1) // 2
    pad_w = (KW - 1) // 2

    # Depthwise math accumulates in f32 (safe on v5e's f32-only VPU).
    x = x_ref[0].astype(jnp.float32)                            # (Cin, P)

    # Flat-index helpers for the image-boundary masks (computed once, reused by taps).
    p_idx = jax.lax.broadcasted_iota(jnp.int32, (Cin, P), 1)
    w_idx = p_idx % W

    # Depthwise KHxKW conv (stride=1, dilation=1) with folded BN scale:
    # each tap is a lane-roll of the resident tile + boundary mask + FMA.
    first = True
    for kh in range(KH):
        dy = kh - pad_h
        for kw in range(KW):
            dx = kw - pad_w
            off = dy * W + dx
            win = x if off == 0 else pltpu.roll(x, (-off) % P, axis=1)
            conds = []
            if dy < 0:
                conds.append(p_idx >= (-dy) * W)                # h + dy >= 0
            if dy > 0:
                conds.append(p_idx < (H - dy) * W)              # h + dy <= H-1
            if dx < 0:
                conds.append(w_idx >= -dx)                      # w + dx >= 0
            if dx > 0:
                conds.append(w_idx < W - dx)                    # w + dx <= W-1
            if conds:
                mask = conds[0]
                for c in conds[1:]:
                    mask = jnp.logical_and(mask, c)
                win = jnp.where(mask, win, 0.0)
            term = win * dwf_ref[kh * KW + kw]                  # (Cin,1) lane-broadcast
            if first:
                acc_ref[...] = term
                first = False
            else:
                acc_ref[...] += term

    # Pointwise 1x1 conv + folded BN bias.
    if use_mxu:
        # (Cin, Cout) x (Cin, P) -> (Cout, P) on the MXU, f32 accumulation.
        out = jax.lax.dot_general(
            pw_ref[...], acc_ref[...],
            dimension_numbers=(((0,), (0,)), ((), ())),
            preferred_element_type=jnp.float32) + bias_ref[...]
    else:
        # Tiny channel counts: Cin broadcast FMAs on the VPU, skip the MXU entirely.
        out = jnp.broadcast_to(bias_ref[...], (Cout, P))
        for c in range(Cin):
            out = out + pw_ref[c] * acc_ref[pl.ds(c, 1), :]     # (Cout,1)*(1,P)

    o_ref[0] = out.astype(o_ref.dtype)                          # lane-dense store


def separable_conv2d(x_nchw, dw_weight, bn_gamma, bn_beta, bn_mean, bn_var,
                     pw_weight, *, eps=1e-5):
    """Forward pass matching the PyTorch SeparableConv2d (kernel=3, stride=1,
    padding=1, dilation=1, bias=False, BatchNorm2d in eval mode).

    x_nchw:    (N, Cin, H, W)
    dw_weight: (Cin, 1, 3, 3)    PyTorch depthwise conv weight layout
    pw_weight: (Cout, Cin, 1, 1) PyTorch pointwise conv weight layout
    returns:   (N, Cout, H, W)
    """
    N, Cin, H, W = x_nchw.shape
    Cout = pw_weight.shape[0]
    KH, KW = dw_weight.shape[2], dw_weight.shape[3]
    P = H * W
    assert dw_weight.shape[:2] == (Cin, 1) and pw_weight.shape[1] == Cin

    # ---- fold BatchNorm (eval mode) into the conv weights: no BN pass in the kernel ----
    scale = (bn_gamma / jnp.sqrt(bn_var + eps)).astype(jnp.float32)           # (Cin,)
    shift = bn_beta.astype(jnp.float32) - bn_mean.astype(jnp.float32) * scale  # (Cin,)
    dwf = dw_weight[:, 0, :, :].astype(jnp.float32) * scale[:, None, None]     # (Cin,KH,KW)
    dwf = jnp.transpose(dwf, (1, 2, 0)).reshape(KH * KW, Cin)[..., None]       # (KH*KW,Cin,1)
    pw_oc = pw_weight[:, :, 0, 0].astype(jnp.float32)                          # (Cout,Cin)
    bias = (pw_oc @ shift).reshape(Cout, 1)                                    # (Cout,1)
    pw_co = jnp.transpose(pw_oc, (1, 0))                                       # (Cin,Cout)

    use_mxu = Cin >= 32              # tiny channels: VPU FMAs; large Cin: keep the MXU fed
    pw_arg = pw_co if use_mxu else pw_co[..., None]

    # Free (metadata-only) reshape: activations cross HBM exactly once each way.
    x_flat = x_nchw.reshape(N, Cin, P)

    kernel = functools.partial(_sepconv_kernel, H=H, W=W, KH=KH, KW=KW,
                               Cin=Cin, Cout=Cout, use_mxu=use_mxu)

    itemsize = jnp.dtype(x_nchw.dtype).itemsize
    blk_bytes = (Cin + Cout) * P * itemsize + (KH * KW * Cin + Cin * Cout + Cout) * 4
    vmem_limit = int(min(max(2 * blk_bytes + Cin * P * 4 + (4 << 20), 8 << 20),
                         48 << 20))  # double-buffered blocks + scratch; <=48 MiB (v7x safe)

    out_flat = pl.pallas_call(
        kernel,
        out_shape=jax.ShapeDtypeStruct((N, Cout, P), x_nchw.dtype),
        grid_spec=pltpu.PrefetchScalarGridSpec(
            num_scalar_prefetch=0,
            grid=(N,),
            in_specs=[
                pl.BlockSpec((1, Cin, P), lambda n: (n, 0, 0)),
                pl.BlockSpec(dwf.shape, lambda n: (0, 0, 0)),
                pl.BlockSpec(pw_arg.shape, lambda n: (0,) * pw_arg.ndim),
                pl.BlockSpec((Cout, 1), lambda n: (0, 0)),
            ],
            out_specs=pl.BlockSpec((1, Cout, P), lambda n: (n, 0, 0)),
            scratch_shapes=[pltpu.VMEM((Cin, P), jnp.float32)],
        ),
        compiler_params=pltpu.CompilerParams(
            dimension_semantics=("parallel",),
            vmem_limit_bytes=vmem_limit,
        ),
    )(x_flat, dwf, pw_arg, bias)

    # TODO(synk): for very large H*W add row-block spatial tiling with a 1-row halo (and a
    # second "parallel" grid axis) to stay within v7x's 64 MiB VMEM and keep both v7x
    # TensorCores busy when N == 1.
    return out_flat.reshape(N, Cout, H, W)


def _reference(x, dw_weight, bn_gamma, bn_beta, bn_mean, bn_var, pw_weight, eps=1e-5):
    """Pure-XLA reference of the PyTorch module (eval-mode BN) for the self-check."""
    Cin = x.shape[1]
    y = jax.lax.conv_general_dilated(
        x, dw_weight, window_strides=(1, 1), padding=((1, 1), (1, 1)),
        dimension_numbers=("NCHW", "OIHW", "NCHW"), feature_group_count=Cin,
        precision=jax.lax.Precision.HIGHEST)
    scale = bn_gamma / jnp.sqrt(bn_var + eps)
    y = y * scale[None, :, None, None] + (bn_beta - bn_mean * scale)[None, :, None, None]
    return jax.lax.conv_general_dilated(
        y, pw_weight, window_strides=(1, 1), padding="VALID",
        dimension_numbers=("NCHW", "OIHW", "NCHW"),
        precision=jax.lax.Precision.HIGHEST)


if __name__ == "__main__":
    # Small shapes consistent with the module: N=2, inplanes=4, planes=8, 16x16 spatial.
    N, Cin, Cout, H, W = 2, 4, 8, 16, 16

    key = jax.random.PRNGKey(0)
    k_x, k_dw, k_pw, k_g, k_b, k_m, k_v = jax.random.split(key, 7)

    x = jax.random.normal(k_x, (N, Cin, H, W), dtype=jnp.float32)
    dw_weight = jax.random.normal(k_dw, (Cin, 1, 3, 3), dtype=jnp.float32) * 0.1
    pw_weight = jax.random.normal(k_pw, (Cout, Cin, 1, 1), dtype=jnp.float32) * 0.1
    bn_gamma = 1.0 + 0.1 * jax.random.normal(k_g, (Cin,), dtype=jnp.float32)
    bn_beta = 0.1 * jax.random.normal(k_b, (Cin,), dtype=jnp.float32)
    bn_mean = 0.1 * jax.random.normal(k_m, (Cin,), dtype=jnp.float32)
    bn_var = 1.0 + 0.1 * jax.random.uniform(k_v, (Cin,), dtype=jnp.float32)
    # TODO(synk): BatchNorm is folded in eval mode (running stats); training-mode batch
    # statistics are not computed in the kernel.

    out = separable_conv2d(x, dw_weight, bn_gamma, bn_beta, bn_mean, bn_var, pw_weight)
    out = jax.block_until_ready(out)
    assert out.shape == (N, Cout, H, W)

    ref = _reference(x, dw_weight, bn_gamma, bn_beta, bn_mean, bn_var, pw_weight)
    assert bool(jnp.allclose(out, ref, rtol=1e-3, atol=1e-4)), "mismatch vs XLA reference"
    print("KERNEL_OK")
</pallas_src>

<mosaic_0001>
module attributes {stable_mosaic.version = 11 : i64} {
  func.func @_sepconv_kernel(%arg0: i32, %arg1: memref<1x4x256xf32, #tpu.memory_space<vmem>>, %arg2: memref<9x4x1xf32, #tpu.memory_space<vmem>>, %arg3: memref<4x8x1xf32, #tpu.memory_space<vmem>>, %arg4: memref<8x1xf32, #tpu.memory_space<vmem>>, %arg5: memref<1x8x256xf32, #tpu.memory_space<vmem>>, %arg6: memref<4x256xf32, #tpu.memory_space<vmem>>) attributes {dimension_semantics = [#tpu.dimension_semantics<parallel>], iteration_bounds = array<i64: 2>, scalar_prefetch = 0 : i64, scratch_operands = 1 : i64, tpu.core_type = #tpu.core_type<tc>, window_params = [{transform_indices = @transform_0, window_bounds = array<i64: 1, 4, 256>}, {pipeline_mode = #tpu.pipeline_mode<synchronous>, transform_indices = @transform_1, window_bounds = array<i64: 9, 4, 1>}, {pipeline_mode = #tpu.pipeline_mode<synchronous>, transform_indices = @transform_2, window_bounds = array<i64: 4, 8, 1>}, {pipeline_mode = #tpu.pipeline_mode<synchronous>, transform_indices = @transform_3, window_bounds = array<i64: 8, 1>}, {transform_indices = @transform_4, window_bounds = array<i64: 1, 8, 256>}]} {
    %c0 = arith.constant 0 : index
    %c0_0 = arith.constant 0 : index
    %c0_1 = arith.constant 0 : index
    %0 = vector.load %arg1[%c0, %c0_0, %c0_1] : memref<1x4x256xf32, #tpu.memory_space<vmem>>, vector<1x4x256xf32>
    %1 = vector.shape_cast %0 : vector<1x4x256xf32> to vector<4x256xf32>
    %2 = tpu.iota {dimensions = array<i32: 1>} : vector<4x256xi32>
    %c16_i32 = arith.constant 16 : i32
    %c0_i32 = arith.constant 0 : i32
    %3 = arith.cmpi eq, %c16_i32, %c0_i32 : i32
    %c1_i32 = arith.constant 1 : i32
    %4 = arith.select %3, %c1_i32, %c16_i32 : i32
    %5 = vector.broadcast %4 : i32 to vector<4x256xi32>
    %6 = arith.remsi %2, %5 : vector<4x256xi32>
    %c0_i32_2 = arith.constant 0 : i32
    %7 = vector.broadcast %c0_i32_2 : i32 to vector<4x256xi32>
    %8 = arith.cmpi ne, %6, %7 : vector<4x256xi32>
    %c0_i32_3 = arith.constant 0 : i32
    %9 = vector.broadcast %c0_i32_3 : i32 to vector<4x256xi32>
    %10 = arith.cmpi slt, %6, %9 : vector<4x256xi32>
    %c0_i32_4 = arith.constant 0 : i32
    %11 = arith.cmpi slt, %4, %c0_i32_4 : i32
    %12 = vector.broadcast %11 : i1 to vector<4x256xi1>
    %13 = vector.broadcast %12 : vector<4x256xi1> to vector<4x256xi1>
    %14 = arith.xori %10, %13 : vector<4x256xi1>
    %15 = arith.andi %14, %8 : vector<4x256xi1>
    %16 = vector.broadcast %4 : i32 to vector<4x256xi32>
    %17 = arith.addi %6, %16 : vector<4x256xi32>
    %18 = arith.select %15, %17, %6 : vector<4x256xi1>, vector<4x256xi32>
    %c17_i32 = arith.constant 17 : i32
    %19 = tpu.dynamic_rotate %1 by %c17_i32 dim 1 : vector<4x256xf32>, i32 -> vector<4x256xf32>
    %c16_i32_5 = arith.constant 16 : i32
    %20 = vector.broadcast %c16_i32_5 : i32 to vector<4x256xi32>
    %21 = arith.cmpi sge, %2, %20 : vector<4x256xi32>
    %c1_i32_6 = arith.constant 1 : i32
    %22 = vector.broadcast %c1_i32_6 : i32 to vector<4x256xi32>
    %23 = arith.cmpi sge, %18, %22 : vector<4x256xi32>
    %24 = arith.andi %21, %23 : vector<4x256xi1>
    %cst = arith.constant 0.000000e+00 : f32
    %25 = vector.broadcast %cst : f32 to vector<4x256xf32>
    %26 = arith.select %24, %19, %25 : vector<4x256xi1>, vector<4x256xf32>
    %c0_7 = arith.constant 0 : index
    %c0_8 = arith.constant 0 : index
    %c0_9 = arith.constant 0 : index
    %27 = vector.load %arg2[%c0_7, %c0_8, %c0_9] : memref<9x4x1xf32, #tpu.memory_space<vmem>>, vector<1x4x1xf32>
    %28 = vector.shape_cast %27 : vector<1x4x1xf32> to vector<4x1xf32>
    %29 = vector.broadcast %28 : vector<4x1xf32> to vector<4x256xf32>
    %30 = arith.mulf %26, %29 : vector<4x256xf32>
    %c0_10 = arith.constant 0 : index
    %c0_11 = arith.constant 0 : index
    %31 = vector.load %arg6[%c0_10, %c0_11] : memref<4x256xf32, #tpu.memory_space<vmem>>, vector<4x256xf32>
    tpu.vector_store %arg6[%c0_10, %c0_11], %30 {strides = array<i32>} : memref<4x256xf32, #tpu.memory_space<vmem>>, vector<4x256xf32>,
    %c16_i32_12 = arith.constant 16 : i32
    %32 = tpu.dynamic_rotate %1 by %c16_i32_12 dim 1 : vector<4x256xf32>, i32 -> vector<4x256xf32>
    %c16_i32_13 = arith.constant 16 : i32
    %33 = vector.broadcast %c16_i32_13 : i32 to vector<4x256xi32>
    %34 = arith.cmpi sge, %2, %33 : vector<4x256xi32>
    %cst_14 = arith.constant 0.000000e+00 : f32
    %35 = vector.broadcast %cst_14 : f32 to vector<4x256xf32>
    %36 = arith.select %34, %32, %35 : vector<4x256xi1>, vector<4x256xf32>
    %c1 = arith.constant 1 : index
    %c0_15 = arith.constant 0 : index
    %c0_16 = arith.constant 0 : index
    %37 = vector.load %arg2[%c1, %c0_15, %c0_16] : memref<9x4x1xf32, #tpu.memory_space<vmem>>, vector<1x4x1xf32>
    %38 = vector.shape_cast %37 : vector<1x4x1xf32> to vector<4x1xf32>
    %39 = vector.broadcast %38 : vector<4x1xf32> to vector<4x256xf32>
    %40 = arith.mulf %36, %39 : vector<4x256xf32>
    %c0_17 = arith.constant 0 : index
    %c0_18 = arith.constant 0 : index
    %41 = vector.load %arg6[%c0_17, %c0_18] : memref<4x256xf32, #tpu.memory_space<vmem>>, vector<4x256xf32>
    %42 = arith.addf %41, %40 : vector<4x256xf32>
    %c0_19 = arith.constant 0 : index
    %c0_20 = arith.constant 0 : index
    %43 = vector.load %arg6[%c0_19, %c0_20] : memref<4x256xf32, #tpu.memory_space<vmem>>, vector<4x256xf32>
    tpu.vector_store %arg6[%c0_19, %c0_20], %42 {strides = array<i32>} : memref<4x256xf32, #tpu.memory_space<vmem>>, vector<4x256xf32>,
    %c15_i32 = arith.constant 15 : i32
    %44 = tpu.dynamic_rotate %1 by %c15_i32 dim 1 : vector<4x256xf32>, i32 -> vector<4x256xf32>
    %c16_i32_21 = arith.constant 16 : i32
    %45 = vector.broadcast %c16_i32_21 : i32 to vector<4x256xi32>
    %46 = arith.cmpi sge, %2, %45 : vector<4x256xi32>
    %c15_i32_22 = arith.constant 15 : i32
    %47 = vector.broadcast %c15_i32_22 : i32 to vector<4x256xi32>
    %48 = arith.cmpi slt, %18, %47 : vector<4x256xi32>
    %49 = arith.andi %46, %48 : vector<4x256xi1>
    %cst_23 = arith.constant 0.000000e+00 : f32
    %50 = vector.broadcast %cst_23 : f32 to vector<4x256xf32>
    %51 = arith.select %49, %44, %50 : vector<4x256xi1>, vector<4x256xf32>
    %c2 = arith.constant 2 : index
    %c0_24 = arith.constant 0 : index
    %c0_25 = arith.constant 0 : index
    %52 = vector.load %arg2[%c2, %c0_24, %c0_25] : memref<9x4x1xf32, #tpu.memory_space<vmem>>, vector<1x4x1xf32>
    %53 = vector.shape_cast %52 : vector<1x4x1xf32> to vector<4x1xf32>
    %54 = vector.broadcast %53 : vector<4x1xf32> to vector<4x256xf32>
    %55 = arith.mulf %51, %54 : vector<4x256xf32>
    %c0_26 = arith.constant 0 : index
    %c0_27 = arith.constant 0 : index
    %56 = vector.load %arg6[%c0_26, %c0_27] : memref<4x256xf32, #tpu.memory_space<vmem>>, vector<4x256xf32>
    %57 = arith.addf %56, %55 : vector<4x256xf32>
    %c0_28 = arith.constant 0 : index
    %c0_29 = arith.constant 0 : index
    %58 = vector.load %arg6[%c0_28, %c0_29] : memref<4x256xf32, #tpu.memory_space<vmem>>, vector<4x256xf32>
    tpu.vector_store %arg6[%c0_28, %c0_29], %57 {strides = array<i32>} : memref<4x256xf32, #tpu.memory_space<vmem>>, vector<4x256xf32>,
    %c1_i32_30 = arith.constant 1 : i32
    %59 = tpu.dynamic_rotate %1 by %c1_i32_30 dim 1 : vector<4x256xf32>, i32 -> vector<4x256xf32>
    %c1_i32_31 = arith.constant 1 : i32
    %60 = vector.broadcast %c1_i32_31 : i32 to vector<4x256xi32>
    %61 = arith.cmpi sge, %18, %60 : vector<4x256xi32>
    %cst_32 = arith.constant 0.000000e+00 : f32
    %62 = vector.broadcast %cst_32 : f32 to vector<4x256xf32>
    %63 = arith.select %61, %59, %62 : vector<4x256xi1>, vector<4x256xf32>
    %c3 = arith.constant 3 : index
    %c0_33 = arith.constant 0 : index
    %c0_34 = arith.constant 0 : index
    %64 = vector.load %arg2[%c3, %c0_33, %c0_34] : memref<9x4x1xf32, #tpu.memory_space<vmem>>, vector<1x4x1xf32>
    %65 = vector.shape_cast %64 : vector<1x4x1xf32> to vector<4x1xf32>
    %66 = vector.broadcast %65 : vector<4x1xf32> to vector<4x256xf32>
    %67 = arith.mulf %63, %66 : vector<4x256xf32>
    %c0_35 = arith.constant 0 : index
    %c0_36 = arith.constant 0 : index
    %68 = vector.load %arg6[%c0_35, %c0_36] : memref<4x256xf32, #tpu.memory_space<vmem>>, vector<4x256xf32>
    %69 = arith.addf %68, %67 : vector<4x256xf32>
    %c0_37 = arith.constant 0 : index
    %c0_38 = arith.constant 0 : index
    %70 = vector.load %arg6[%c0_37, %c0_38] : memref<4x256xf32, #tpu.memory_space<vmem>>, vector<4x256xf32>
    tpu.vector_store %arg6[%c0_37, %c0_38], %69 {strides = array<i32>} : memref<4x256xf32, #tpu.memory_space<vmem>>, vector<4x256xf32>,
    %c4 = arith.constant 4 : index
    %c0_39 = arith.constant 0 : index
    %c0_40 = arith.constant 0 : index
    %71 = vector.load %arg2[%c4, %c0_39, %c0_40] : memref<9x4x1xf32, #tpu.memory_space<vmem>>, vector<1x4x1xf32>
    %72 = vector.shape_cast %71 : vector<1x4x1xf32> to vector<4x1xf32>
    %73 = vector.broadcast %72 : vector<4x1xf32> to vector<4x256xf32>
    %74 = arith.mulf %1, %73 : vector<4x256xf32>
    %c0_41 = arith.constant 0 : index
    %c0_42 = arith.constant 0 : index
    %75 = vector.load %arg6[%c0_41, %c0_42] : memref<4x256xf32, #tpu.memory_space<vmem>>, vector<4x256xf32>
    %76 = arith.addf %75, %74 : vector<4x256xf32>
    %c0_43 = arith.constant 0 : index
    %c0_44 = arith.constant 0 : index
    %77 = vector.load %arg6[%c0_43, %c0_44] : memref<4x256xf32, #tpu.memory_space<vmem>>, vector<4x256xf32>
    tpu.vector_store %arg6[%c0_43, %c0_44], %76 {strides = array<i32>} : memref<4x256xf32, #tpu.memory_space<vmem>>, vector<4x256xf32>,
    %c255_i32 = arith.constant 255 : i32
    %78 = tpu.dynamic_rotate %1 by %c255_i32 dim 1 : vector<4x256xf32>, i32 -> vector<4x256xf32>
    %c15_i32_45 = arith.constant 15 : i32
    %79 = vector.broadcast %c15_i32_45 : i32 to vector<4x256xi32>
    %80 = arith.cmpi slt, %18, %79 : vector<4x256xi32>
    %cst_46 = arith.constant 0.000000e+00 : f32
    %81 = vector.broadcast %cst_46 : f32 to vector<4x256xf32>
    %82 = arith.select %80, %78, %81 : vector<4x256xi1>, vector<4x256xf32>
    %c5 = arith.constant 5 : index
    %c0_47 = arith.constant 0 : index
    %c0_48 = arith.constant 0 : index
    %83 = vector.load %arg2[%c5, %c0_47, %c0_48] : memref<9x4x1xf32, #tpu.memory_space<vmem>>, vector<1x4x1xf32>
    %84 = vector.shape_cast %83 : vector<1x4x1xf32> to vector<4x1xf32>
    %85 = vector.broadcast %84 : vector<4x1xf32> to vector<4x256xf32>
    %86 = arith.mulf %82, %85 : vector<4x256xf32>
    %c0_49 = arith.constant 0 : index
    %c0_50 = arith.constant 0 : index
    %87 = vector.load %arg6[%c0_49, %c0_50] : memref<4x256xf32, #tpu.memory_space<vmem>>, vector<4x256xf32>
    %88 = arith.addf %87, %86 : vector<4x256xf32>
    %c0_51 = arith.constant 0 : index
    %c0_52 = arith.constant 0 : index
    %89 = vector.load %arg6[%c0_51, %c0_52] : memref<4x256xf32, #tpu.memory_space<vmem>>, vector<4x256xf32>
    tpu.vector_store %arg6[%c0_51, %c0_52], %88 {strides = array<i32>} : memref<4x256xf32, #tpu.memory_space<vmem>>, vector<4x256xf32>,
    %c241_i32 = arith.constant 241 : i32
    %90 = tpu.dynamic_rotate %1 by %c241_i32 dim 1 : vector<4x256xf32>, i32 -> vector<4x256xf32>
    %c240_i32 = arith.constant 240 : i32
    %91 = vector.broadcast %c240_i32 : i32 to vector<4x256xi32>
    %92 = arith.cmpi slt, %2, %91 : vector<4x256xi32>
    %c1_i32_53 = arith.constant 1 : i32
    %93 = vector.broadcast %c1_i32_53 : i32 to vector<4x256xi32>
    %94 = arith.cmpi sge, %18, %93 : vector<4x256xi32>
    %95 = arith.andi %92, %94 : vector<4x256xi1>
    %cst_54 = arith.constant 0.000000e+00 : f32
    %96 = vector.broadcast %cst_54 : f32 to vector<4x256xf32>
    %97 = arith.select %95, %90, %96 : vector<4x256xi1>, vector<4x256xf32>
    %c6 = arith.constant 6 : index
    %c0_55 = arith.constant 0 : index
    %c0_56 = arith.constant 0 : index
    %98 = vector.load %arg2[%c6, %c0_55, %c0_56] : memref<9x4x1xf32, #tpu.memory_space<vmem>>, vector<1x4x1xf32>
    %99 = vector.shape_cast %98 : vector<1x4x1xf32> to vector<4x1xf32>
    %100 = vector.broadcast %99 : vector<4x1xf32> to vector<4x256xf32>
    %101 = arith.mulf %97, %100 : vector<4x256xf32>
    %c0_57 = arith.constant 0 : index
    %c0_58 = arith.constant 0 : index
    %102 = vector.load %arg6[%c0_57, %c0_58] : memref<4x256xf32, #tpu.memory_space<vmem>>, vector<4x256xf32>
    %103 = arith.addf %102, %101 : vector<4x256xf32>
    %c0_59 = arith.constant 0 : index
    %c0_60 = arith.constant 0 : index
    %104 = vector.load %arg6[%c0_59, %c0_60] : memref<4x256xf32, #tpu.memory_space<vmem>>, vector<4x256xf32>
    tpu.vector_store %arg6[%c0_59, %c0_60], %103 {strides = array<i32>} : memref<4x256xf32, #tpu.memory_space<vmem>>, vector<4x256xf32>,
    %c240_i32_61 = arith.constant 240 : i32
    %105 = tpu.dynamic_rotate %1 by %c240_i32_61 dim 1 : vector<4x256xf32>, i32 -> vector<4x256xf32>
    %c240_i32_62 = arith.constant 240 : i32
    %106 = vector.broadcast %c240_i32_62 : i32 to vector<4x256xi32>
    %107 = arith.cmpi slt, %2, %106 : vector<4x256xi32>
    %cst_63 = arith.constant 0.000000e+00 : f32
    %108 = vector.broadcast %cst_63 : f32 to vector<4x256xf32>
    %109 = arith.select %107, %105, %108 : vector<4x256xi1>, vector<4x256xf32>
    %c7 = arith.constant 7 : index
    %c0_64 = arith.constant 0 : index
    %c0_65 = arith.constant 0 : index
    %110 = vector.load %arg2[%c7, %c0_64, %c0_65] : memref<9x4x1xf32, #tpu.memory_space<vmem>>, vector<1x4x1xf32>
    %111 = vector.shape_cast %110 : vector<1x4x1xf32> to vector<4x1xf32>
    %112 = vector.broadcast %111 : vector<4x1xf32> to vector<4x256xf32>
    %113 = arith.mulf %109, %112 : vector<4x256xf32>
    %c0_66 = arith.constant 0 : index
    %c0_67 = arith.constant 0 : index
    %114 = vector.load %arg6[%c0_66, %c0_67] : memref<4x256xf32, #tpu.memory_space<vmem>>, vector<4x256xf32>
    %115 = arith.addf %114, %113 : vector<4x256xf32>
    %c0_68 = arith.constant 0 : index
    %c0_69 = arith.constant 0 : index
    %116 = vector.load %arg6[%c0_68, %c0_69] : memref<4x256xf32, #tpu.memory_space<vmem>>, vector<4x256xf32>
    tpu.vector_store %arg6[%c0_68, %c0_69], %115 {strides = array<i32>} : memref<4x256xf32, #tpu.memory_space<vmem>>, vector<4x256xf32>,
    %c239_i32 = arith.constant 239 : i32
    %117 = tpu.dynamic_rotate %1 by %c239_i32 dim 1 : vector<4x256xf32>, i32 -> vector<4x256xf32>
    %c240_i32_70 = arith.constant 240 : i32
    %118 = vector.broadcast %c240_i32_70 : i32 to vector<4x256xi32>
    %119 = arith.cmpi slt, %2, %118 : vector<4x256xi32>
    %c15_i32_71 = arith.constant 15 : i32
    %120 = vector.broadcast %c15_i32_71 : i32 to vector<4x256xi32>
    %121 = arith.cmpi slt, %18, %120 : vector<4x256xi32>
    %122 = arith.andi %119, %121 : vector<4x256xi1>
    %cst_72 = arith.constant 0.000000e+00 : f32
    %123 = vector.broadcast %cst_72 : f32 to vector<4x256xf32>
    %124 = arith.select %122, %117, %123 : vector<4x256xi1>, vector<4x256xf32>
    %c8 = arith.constant 8 : index
    %c0_73 = arith.constant 0 : index
    %c0_74 = arith.constant 0 : index
    %125 = vector.load %arg2[%c8, %c0_73, %c0_74] : memref<9x4x1xf32, #tpu.memory_space<vmem>>, vector<1x4x1xf32>
    %126 = vector.shape_cast %125 : vector<1x4x1xf32> to vector<4x1xf32>
    %127 = vector.broadcast %126 : vector<4x1xf32> to vector<4x256xf32>
    %128 = arith.mulf %124, %127 : vector<4x256xf32>
    %c0_75 = arith.constant 0 : index
    %c0_76 = arith.constant 0 : index
    %129 = vector.load %arg6[%c0_75, %c0_76] : memref<4x256xf32, #tpu.memory_space<vmem>>, vector<4x256xf32>
    %130 = arith.addf %129, %128 : vector<4x256xf32>
    %c0_77 = arith.constant 0 : index
    %c0_78 = arith.constant 0 : index
    %131 = vector.load %arg6[%c0_77, %c0_78] : memref<4x256xf32, #tpu.memory_space<vmem>>, vector<4x256xf32>
    tpu.vector_store %arg6[%c0_77, %c0_78], %130 {strides = array<i32>} : memref<4x256xf32, #tpu.memory_space<vmem>>, vector<4x256xf32>,
    %c0_79 = arith.constant 0 : index
    %c0_80 = arith.constant 0 : index
    %132 = vector.load %arg4[%c0_79, %c0_80] : memref<8x1xf32, #tpu.memory_space<vmem>>, vector<8x1xf32>
    %133 = vector.shape_cast %132 : vector<8x1xf32> to vector<8x1xf32>
    %134 = vector.broadcast %133 : vector<8x1xf32> to vector<8x256xf32>
    %c0_81 = arith.constant 0 : index
    %c0_82 = arith.constant 0 : index
    %c0_83 = arith.constant 0 : index
    %135 = vector.load %arg3[%c0_81, %c0_82, %c0_83] : memref<4x8x1xf32, #tpu.memory_space<vmem>>, vector<1x8x1xf32>
    %136 = vector.shape_cast %135 : vector<1x8x1xf32> to vector<8x1xf32>
    %c0_84 = arith.constant 0 : index
    %c0_85 = arith.constant 0 : index
    %137 = vector.load %arg6[%c0_84, %c0_85] : memref<4x256xf32, #tpu.memory_space<vmem>>, vector<1x256xf32>
    %138 = vector.broadcast %136 : vector<8x1xf32> to vector<8x256xf32>
    %139 = vector.broadcast %137 : vector<1x256xf32> to vector<8x256xf32>
    %140 = arith.mulf %138, %139 : vector<8x256xf32>
    %141 = arith.addf %134, %140 : vector<8x256xf32>
    %c1_86 = arith.constant 1 : index
    %c0_87 = arith.constant 0 : index
    %c0_88 = arith.constant 0 : index
    %142 = vector.load %arg3[%c1_86, %c0_87, %c0_88] : memref<4x8x1xf32, #tpu.memory_space<vmem>>, vector<1x8x1xf32>
    %143 = vector.shape_cast %142 : vector<1x8x1xf32> to vector<8x1xf32>
    %c1_89 = arith.constant 1 : index
    %c0_90 = arith.constant 0 : index
    %144 = vector.load %arg6[%c1_89, %c0_90] : memref<4x256xf32, #tpu.memory_space<vmem>>, vector<1x256xf32>
    %145 = vector.broadcast %143 : vector<8x1xf32> to vector<8x256xf32>
    %146 = vector.broadcast %144 : vector<1x256xf32> to vector<8x256xf32>
    %147 = arith.mulf %145, %146 : vector<8x256xf32>
    %148 = arith.addf %141, %147 : vector<8x256xf32>
    %c2_91 = arith.constant 2 : index
    %c0_92 = arith.constant 0 : index
    %c0_93 = arith.constant 0 : index
    %149 = vector.load %arg3[%c2_91, %c0_92, %c0_93] : memref<4x8x1xf32, #tpu.memory_space<vmem>>, vector<1x8x1xf32>
    %150 = vector.shape_cast %149 : vector<1x8x1xf32> to vector<8x1xf32>
    %c2_94 = arith.constant 2 : index
    %c0_95 = arith.constant 0 : index
    %151 = vector.load %arg6[%c2_94, %c0_95] : memref<4x256xf32, #tpu.memory_space<vmem>>, vector<1x256xf32>
    %152 = vector.broadcast %150 : vector<8x1xf32> to vector<8x256xf32>
    %153 = vector.broadcast %151 : vector<1x256xf32> to vector<8x256xf32>
    %154 = arith.mulf %152, %153 : vector<8x256xf32>
    %155 = arith.addf %148, %154 : vector<8x256xf32>
    %c3_96 = arith.constant 3 : index
    %c0_97 = arith.constant 0 : index
    %c0_98 = arith.constant 0 : index
    %156 = vector.load %arg3[%c3_96, %c0_97, %c0_98] : memref<4x8x1xf32, #tpu.memory_space<vmem>>, vector<1x8x1xf32>
    %157 = vector.shape_cast %156 : vector<1x8x1xf32> to vector<8x1xf32>
    %c3_99 = arith.constant 3 : index
    %c0_100 = arith.constant 0 : index
    %158 = vector.load %arg6[%c3_99, %c0_100] : memref<4x256xf32, #tpu.memory_space<vmem>>, vector<1x256xf32>
    %159 = vector.broadcast %157 : vector<8x1xf32> to vector<8x256xf32>
    %160 = vector.broadcast %158 : vector<1x256xf32> to vector<8x256xf32>
    %161 = arith.mulf %159, %160 : vector<8x256xf32>
    %162 = arith.addf %155, %161 : vector<8x256xf32>
    %c0_101 = arith.constant 0 : index
    %c0_102 = arith.constant 0 : index
    %c0_103 = arith.constant 0 : index
    %163 = vector.load %arg5[%c0_101, %c0_102, %c0_103] : memref<1x8x256xf32, #tpu.memory_space<vmem>>, vector<1x8x256xf32>
    %164 = vector.shape_cast %163 : vector<1x8x256xf32> to vector<8x256xf32>
    %165 = vector.shape_cast %162 : vector<8x256xf32> to vector<1x8x256xf32>
    tpu.vector_store %arg5[%c0_101, %c0_102, %c0_103], %165 {strides = array<i32>} : memref<1x8x256xf32, #tpu.memory_space<vmem>>, vector<1x8x256xf32>,
    return
  }
  func.func @transform_0(%arg0: i32) -> (i32, i32, i32) {
    %c0_i32 = arith.constant 0 : i32
    %c0_i32_0 = arith.constant 0 : i32
    %c0_i32_1 = arith.constant 0 : i32
    return %arg0, %c0_i32, %c0_i32_0 : i32, i32, i32
  }
  func.func @transform_1(%arg0: i32) -> (i32, i32, i32) {
    %c0_i32 = arith.constant 0 : i32
    %c0_i32_0 = arith.constant 0 : i32
    %c0_i32_1 = arith.constant 0 : i32
    %c0_i32_2 = arith.constant 0 : i32
    return %c0_i32, %c0_i32_0, %c0_i32_1 : i32, i32, i32
  }
  func.func @transform_2(%arg0: i32) -> (i32, i32, i32) {
    %c0_i32 = arith.constant 0 : i32
    %c0_i32_0 = arith.constant 0 : i32
    %c0_i32_1 = arith.constant 0 : i32
    %c0_i32_2 = arith.constant 0 : i32
    return %c0_i32, %c0_i32_0, %c0_i32_1 : i32, i32, i32
  }
  func.func @transform_3(%arg0: i32) -> (i32, i32) {
    %c0_i32 = arith.constant 0 : i32
    %c0_i32_0 = arith.constant 0 : i32
    %c0_i32_1 = arith.constant 0 : i32
    return %c0_i32, %c0_i32_0 : i32, i32
  }
  func.func @transform_4(%arg0: i32) -> (i32, i32, i32) {
    %c0_i32 = arith.constant 0 : i32
    %c0_i32_0 = arith.constant 0 : i32
    %c0_i32_1 = arith.constant 0 : i32
    return %arg0, %c0_i32, %c0_i32_0 : i32, i32, i32
  }
}

</mosaic_0001>

<bundles_post_ra>
// kernel: tpu_custom_call.1
= control target key start
LH: loop header
LB: loop body
LE: loop exit
PB: predicated region body
PF: predicated region fallthrough
CT: control target
= control target key end

     0   :  { %9 = vsyncpa [#allocation4], 0  ;;  %s1128_s0 = inlined_call_operand.vmem [shape: f32[2,4,256], index: 0, kind: input, shape index: {}]   ;;  %s1129_s1 = inlined_call_operand.vmem [shape: f32[9,4,1], index: 1, kind: input, shape index: {}]   ;;  %s1130_s2 = inlined_call_operand.vmem [shape: f32[4,8,1], index: 2, kind: input, shape index: {}]   ;;  %s1131_s3 = inlined_call_operand.vmem [shape: f32[8,1], index: 3, kind: input, shape index: {}]   ;;  %s1132_s4 = inlined_call_operand.hbm [shape: f32[2,8,256], index: 4, kind: output, shape index: {}]  }
   0x1   :  { %11 = vsyncpa [#allocation4 + $0x1], 0  ;;  %s832_s15 = smov 0   ;;  %s834_s16 = smov 0  }
   0x2   :  { %s836_s17 = smov 0   ;;  %s838_s18 = smov 0  }
   0x3 LB: > { %s853_s19 = sadd.s32 4294967295, %s795_s18   ;;  %s656_s20 = sadd.s32 4294967294, %s795_s18   ;;  %s795_s18 = sphi %s838_s18, %s1152_s18   ;;  %s791_s17 = sphi %s836_s17, %s1151_s17   ;;  %s787_s16 = sphi %s834_s16, %s1150_s16   ;;  %s783_s15 = sphi %s832_s15, %s1149_s15  }
   0x4   : > { %s857_s21 = sadd.s32 1, %s795_s18   ;;  %s113_s22 = sadd.s32 1, %s791_s17 }
   0x5   : > { %s110_s23 = ssub.s32 %s795_s18, %s857_s21  ;;  %p123_p0 = scmp.ne.s32.totalorder %s791_s17, %s787_s16 }
   0x6   : > { %p111_p1 = scmp.eq.s32.totalorder %s110_s23, 0  ;;  %p124_p2 = scmp.eq.s32.totalorder %s853_s19, 1 }
   0x7   : > { %p129_p3 = scmp.ne.s32.totalorder %s787_s16, %s783_s15  ;;  %p130_p4 = scmp.eq.s32.totalorder %s656_s20, 1 }
   0x8   : > { %s868_s24 = scalar_select %p111_p1, %s791_s17, %s113_s22  }
   0x9   : > { %p870_p5 = por %p124_p2, %p123_p0  ;;  %p874_p6 = por %p130_p4, %p129_p3 }
   0xa   : > { %p659_p7 = scmp.ge.s32.totalorder %s795_s18, 1  ;;  %p165_p8 = scmp.lt.s32.totalorder %s795_s18, 3 }
   0xc   : > { %p166_p9 = pnand %p659_p7, %p165_p8 }
   0xd   : > { %p191_p10 = scmp.lt.s32.totalorder (!%p166_p9), %s853_s19, 1  ;;  %s798_s8 = smov (!%p166_p9), 17  }
   0xe   : > { %169 = sbr.rel (%p166_p9) target bundleno = 243 (0xf3), region = 36  ;;  %s799_s9 = smov (!%p166_p9), 16  }
   0xf   : > { %s800_s12 = smov (!%p166_p9), 15   ;;  %s801_s20 = smov (!%p166_p9), 1  }
  0x10   : > { %s803_s6 = smov (!%p166_p9), 113   ;;  %s680_s10 = sshll.u32 (!%p166_p9), %s853_s19, 4 }
  0x11   : > { %s592_s13 = scalar_lea.hbm (!%p166_p9), %s1132_s4, %s680_s10 }
  0x13   : > { %v245_v0 = vld [vmem:[%s1129_s1] sm:$0xf]  ;;  %v797_v1 = vmov 0   ;;  %s192_s29 = scalar_select %p191_p10, %s853_s19, 1  ;;  %v663_v7 = vld [vmem:[%s1129_s1 + $0x4] sm:$0xf]  ;;  %v197_v42 = vlaneseq }
  0x14   : > { %730 = vset.pattern.permute.xlu1 %v797_v1  ;;  %731 = vset.pattern.permute.xlu2 %v797_v1  ;;  %v664_v10 = vld [vmem:[%s1129_s1 + $0x8] sm:$0xf]  ;;  %v665_v13 = vld [vmem:[%s1129_s1 + $0xc] sm:$0xf]  ;;  %v666_v14 = vld [vmem:[%s1129_s1 + $0x10] sm:$0xf] }
  0x15   : > { %248 = vperm.xlu1 %730, %v245_v0   ;;  %732 = vset.pattern.permute.xlu0 %v797_v1  ;;  %s679_s30 = sshll.u32 %s192_s29, 3  ;;  %s802_s29 = smov 127   ;;  %v667_v17 = vld [vmem:[%s1129_s1 + $0x14] sm:$0xf]  ;;  %v668_v20 = vld [vmem:[%s1129_s1 + $0x18] sm:$0xf] }
  0x16   : > { %s195_s7 = scalar_lea.vmem %s1128_s0, %s679_s30  ;;  %v669_v23 = vld [vmem:[%s1129_s1 + $0x1c] sm:$0xf]  ;;  %v502_v25 = vld [vmem:[%s1131_s3] sm:$0xff]  ;;  %v671_v30 = vld [vmem:[%s1130_s2 + $0x8] sm:$0xff]  ;;  %v943_v45 = vand.u32 127, %v197_v42  ;;  %s753_s30 = scalar_lea.hbm %s1132_s4, 32 }
  0x17   : > { %v888_v2 = vld [vmem:[%s195_s7] sm:$0xff]  ;;  %v673_v28 = vld [vmem:[%s1130_s2 + $0x18] sm:$0xff]  ;;  %v672_v31 = vld [vmem:[%s1130_s2 + $0x10] sm:$0xff] }
  0x18   : > { %225 = vst [vmem:[#allocation1] ss:$2 sm:$0xff] %v888_v2  ;;  %v670_v27 = vld [vmem:[%s1129_s1 + $0x20] sm:$0xf]  ;;  %v948_v47 = vadd.s32 128, %v943_v45  ;;  %vm234_vm0 = vcmp.lt.s32.totalorder %v943_v45, 17 }
  0x19   : > { %v508_v29 = vld [vmem:[%s1130_s2] sm:$0xff]  ;;  %v204_v51 = vand.u32 15, %v943_v45  ;;  %vm300_vm1 = vcmp.lt.s32.totalorder %v943_v45, 15  ;;  %vm269_vm3 = vcmp.lt.s32.totalorder %v943_v45, 16  ;;  %vm237_vm4 = vcmp.ge.s32.totalorder %v943_v45, 16 }
  0x1a   : > { %v211_v50 = vand.u32 15, %v948_v47  ;;  %vm335_vm6 = vcmp.lt.s32.totalorder %v943_v45, 1  ;;  %vm381_vm11 = vcmp.lt.s32.totalorder %v943_v45, 127  ;;  %vm412_vm12 = vcmp.lt.s32.totalorder %v943_v45, 113 }
  0x1b   : > { %vm977_vm7 = vcmp.ge.s32.totalorder %v204_v51, 1  ;;  %vm983_vm8 = vcmp.lt.s32.totalorder %v204_v51, 15  ;;  %vm416_vm13 = vcmp.lt.s32.totalorder %v948_v47, 240  ;;  %vm447_vm14 = vcmp.lt.s32.totalorder %v943_v45, 112 }
  0x1c   : > { %vm960_vm2 = vcmp.ge.s32.totalorder %v211_v50, 1  ;;  %vm968_vm5 = vcmp.lt.s32.totalorder %v211_v50, 15  ;;  %vm995_vm9 = vmand %vm237_vm4, %vm977_vm7 }
  0x1d   : > { %vm1008_vm10 = vmand %vm237_vm4, %vm983_vm8 }
  0x1e   : > { %vm1039_vm15 = vmand %vm416_vm13, %vm960_vm2 }
  0x1f   : > { %v226_v3 = vld.sshfl [vmem:[#allocation1] sm:$0xff pattern:$0x75316420]  ;;  %v227_v4 = vld.sshfl [vmem:[#allocation1 + $0x8] sm:$0xff pattern:$0x75316420] }
  0x20   : > { %230 = vrot.lane.b32.xlu0 %v226_v3, %s798_s8  ;;  %260 = vst [vmem:[#allocation1] ss:$2 sm:$0xff] %v888_v2 }
  0x27   : > { %v262_v5 = vld.sshfl [vmem:[#allocation1 + $0x8] sm:$0xff pattern:$0x75316420]  ;;  %v261_v6 = vld.sshfl [vmem:[#allocation1] sm:$0xff pattern:$0x75316420] }
  0x28   : > { %232 = vrot.lane.b32.xlu0 %v227_v4, %s798_s8  ;;  %267 = vrot.lane.b32.xlu2 %v262_v5, %s799_s9  ;;  %291 = vst [vmem:[#allocation1] ss:$2 sm:$0xff] %v888_v2  ;;  %s188_s8 = sand.u32 1, %s787_s16  }
  0x29   : > { %265 = vrot.lane.b32.xlu1 %v261_v6, %s799_s9  ;;  %s804_s9 = smov 112   ;;  %s581_s22 = scalar_lea.sflag [#allocation4], %s188_s8 }
  0x2f   : > { %v293_v8 = vld.sshfl [vmem:[#allocation1 + $0x8] sm:$0xff pattern:$0x75316420]  ;;  %v292_v9 = vld.sshfl [vmem:[#allocation1] sm:$0xff pattern:$0x75316420] }
  0x30   : > { %278 = vperm.xlu2 %731, %v663_v7   ;;  %296 = vrot.lane.b32.xlu0 %v292_v9, %s800_s12  ;;  %326 = vst [vmem:[#allocation1] ss:$2 sm:$0xff] %v888_v2 }
  0x31   : > { %298 = vrot.lane.b32.xlu1 %v293_v8, %s800_s12  ;;  %s805_s12 = smov 111  }
  0x37   : > { %v328_v11 = vld.sshfl [vmem:[#allocation1 + $0x8] sm:$0xff pattern:$0x75316420]  ;;  %v327_v12 = vld.sshfl [vmem:[#allocation1] sm:$0xff pattern:$0x75316420] }
  0x38   : > { %313 = vperm.xlu2 %731, %v664_v10   ;;  %331 = vrot.lane.b32.xlu0 %v327_v12, %s801_s20  ;;  %372 = vst [vmem:[#allocation1] ss:$2 sm:$0xff] %v888_v2  ;;  %v806_v10 = vmov 839922192  }
  0x39   : > { %333 = vrot.lane.b32.xlu1 %v328_v11, %s801_s20  ;;  %v364_v11 = vunpack.c.l.s4 %v806_v10  ;;  %s596_s20 = sshll.u32 %s592_s13, 4  ;;  %s597_s20 = int_to_ptr.hbm [resolvable:$true] %s596_s20 }
  0x3a   : > { %s747_s23 = sshra.s32 %s597_s20, 4  ;;  %s748_s23 = int_to_ptr.hbm [resolvable:$true] %s747_s23 }
  0x3b   : > { %s749_s27 = scalar_lea.hbm %s748_s23, 16  ;;  %p754_p0 = scmp.lt.s32.totalorder %s748_s23, %s1132_s4 }
  0x3c   : > { %p750_p11 = scmp.ne.s32.totalorder %s748_s23, %s749_s27  ;;  %p755_p1 = scmp.lt.s32.totalorder %s753_s30, %s749_s27 }
  0x3e   : > { %p751_p12 = pnand %p750_p11, %p870_p5  ;;  %p756_p2 = por %p755_p1, %p754_p0 }
  0x3f   : > { %v373_v15 = vld.sshfl [vmem:[#allocation1] sm:$0xff pattern:$0x75316420]  ;;  %v374_v16 = vld.sshfl [vmem:[#allocation1 + $0x8] sm:$0xff pattern:$0x75316420] }
  0x40   : > { %344 = vperm.xlu2 %731, %v665_v13   ;;  %361 = vperm.xlu0 %732, %v666_v14   ;;  %403 = vst [vmem:[#allocation1] ss:$2 sm:$0xff] %v888_v2  ;;  %p752_p13 = pneg %p751_p12 }
  0x41   : > { %377 = vrot.lane.b32.xlu1 %v373_v15, %s802_s29 }
  0x42   : > { %p757_p3 = pnand %p756_p2, %p752_p13 }
  0x47   : > { %v405_v18 = vld.sshfl [vmem:[#allocation1 + $0x8] sm:$0xff pattern:$0x75316420]  ;;  %v404_v19 = vld.sshfl [vmem:[#allocation1] sm:$0xff pattern:$0x75316420] }
  0x48   : > { %379 = vrot.lane.b32.xlu2 %v374_v16, %s802_s29  ;;  %410 = vrot.lane.b32.xlu0 %v405_v18, %s803_s6  ;;  %438 = vst [vmem:[#allocation1] ss:$2 sm:$0xff] %v888_v2 }
  0x49   : > { %390 = vperm.xlu1 %730, %v667_v17  }
  0x4f   : > { %v440_v21 = vld.sshfl [vmem:[#allocation1 + $0x8] sm:$0xff pattern:$0x75316420]  ;;  %v439_v22 = vld.sshfl [vmem:[#allocation1] sm:$0xff pattern:$0x75316420] }
  0x50   : > { %408 = vrot.lane.b32.xlu2 %v404_v19, %s803_s6  ;;  %445 = vrot.lane.b32.xlu0 %v440_v21, %s804_s9  ;;  %469 = vst [vmem:[#allocation1] ss:$2 sm:$0xff] %v888_v2 }
  0x51   : > { %425 = vperm.xlu1 %730, %v668_v20  }
  0x57   : > { %v471_v24 = vld.sshfl [vmem:[#allocation1 + $0x8] sm:$0xff pattern:$0x75316420]  ;;  %v470_v26 = vld.sshfl [vmem:[#allocation1] sm:$0xff pattern:$0x75316420] }
  0x58   : > { %443 = vrot.lane.b32.xlu2 %v439_v22, %s804_s9  ;;  %476 = vrot.lane.b32.xlu0 %v471_v24, %s805_s12  ;;  %s660_s9 = sshll.u32 %s188_s8, 4 }
  0x59   : > { %456 = vperm.xlu1 %730, %v669_v23   ;;  %s190_s19 = scalar_lea.vmem [#allocation3], %s660_s9 }
  0x5a   : > { %s594_s14 = sshll.u32 %s190_s19, 4  ;;  %s595_s14 = int_to_ptr.vmem [resolvable:$true] %s594_s14 }
  0x60   : > { %505 = vperm.xlu0 %732, %v502_v25   ;;  %474 = vrot.lane.b32.xlu2 %v470_v26, %s805_s12 }
  0x61   : > { %489 = vperm.xlu1 %730, %v670_v27  }
  0x68   : > { %566 = vperm.xlu0 %732, %v673_v28   ;;  %512 = vperm.xlu2 %731, %v508_v29   ;;  %v365_v28 = vunpack.c.0.s8 %v364_v11 }
  0x69   : > { %530 = vperm.xlu1 %730, %v671_v30  }
  0x70   : > { %548 = vperm.xlu2 %731, %v672_v31  }
  0x82   : > { %v268_v32 = vpop.permute.xlu2 %267 }
  0x87   : > { %v937_v34 = vpop.permute.xlu1 %248 }
  0x8a   : > { %v279_v33 = vpop.permute.xlu2 %278 }
  0x92   : > { %v231_v35 = vpop.permute.xlu0 %230  ;;  %v939_v36 = vpop.permute.xlu2 %313 }
  0x9a   : > { %v233_v37 = vpop.permute.xlu0 %232  ;;  %v941_v41 = vpop.permute.xlu2 %344 }
  0x9b   : > { %v266_v38 = vpop.permute.xlu1 %265  ;;  %v235_v54 = vsel %vm234_vm0, %v231_v35, %v233_v37  ;;  %v236_v4 = vsel %vm234_vm0, %v233_v37, %v231_v35  ;;  %vm256_vm0 = vcmask 1043456  }
  0x9c   : > { %v244_v60 = vsel %vm960_vm2, %v235_v54, 0.0  ;;  %v270_v61 = vsel %vm269_vm3, %v266_v38, %v268_v32  ;;  %v271_v62 = vsel %vm269_vm3, %v268_v32, %v266_v38  ;;  %v243_v14 = vsel %vm995_vm9, %v236_v4, 0.0 }
  0x9d   : > { %v252_v5 = vmul.f32 %v937_v34, %v244_v60  ;;  %v272_v6 = vsel %vm237_vm4, %v271_v62, 0.0  ;;  %v282_v7 = vmul.f32 %v279_v33, %v270_v61  ;;  %v251_v29 = vmul.f32 %v937_v34, %v243_v14 }
  0x9e   : > { %v281_v15 = vmul.f32 %v279_v33, %v272_v6 }
  0x9f   : > { %v255_v17 = vrot.slane %v252_v5, 4  ;;  %v286_v18 = vrot.slane %v282_v7, 4 }
  0xa1   : > { %v257_v37 = vsel %vm256_vm0, %v251_v29, %v255_v17  ;;  %v287_v38 = vsel %vm256_vm0, %v281_v15, %v286_v18 }
  0xa2   : > { %v297_v39 = vpop.permute.xlu0 %296  ;;  %v945_v46 = vpop.permute.xlu2 %379  ;;  %v289_v53 = vadd.f32 %v287_v38, %v257_v37 }
  0xa3   : > { %v299_v40 = vpop.permute.xlu1 %298 }
  0xa4   : > { %v301_v57 = vsel %vm300_vm1, %v297_v39, %v299_v40  ;;  %v302_v9 = vsel %vm300_vm1, %v299_v40, %v297_v39  ;;  %vm478_vm1 = vcmp.lt.s32.totalorder %v943_v45, 111 }
  0xa5   : > { %v308_v0 = vsel %vm968_vm5, %v301_v57, 0.0  ;;  %v307_v19 = vsel %vm1008_vm10, %v302_v9, 0.0 }
  0xa6   : > { %v317_v12 = vmul.f32 %v939_v36, %v308_v0  ;;  %v316_v31 = vmul.f32 %v939_v36, %v307_v19 }
  0xa8   : > { %v321_v27 = vrot.slane %v317_v12, 4 }
  0xaa   : > { %v332_v43 = vpop.permute.xlu0 %331  ;;  %v958_v52 = vpop.permute.xlu2 %408  ;;  %v322_v40 = vsel %vm256_vm0, %v316_v31, %v321_v27 }
  0xab   : > { %v334_v44 = vpop.permute.xlu1 %333  ;;  %v324_v61 = vadd.f32 %v322_v40, %v289_v53 }
  0xac   : > { %v336_v1 = vsel %vm335_vm6, %v332_v43, %v334_v44  ;;  %v337_v22 = vsel %vm335_vm6, %v334_v44, %v332_v43 }
  0xad   : > { %v339_v13 = vsel %vm960_vm2, %v336_v1, 0.0  ;;  %v338_v32 = vsel %vm977_vm7, %v337_v22, 0.0  ;;  %vm482_vm2 = vmand %vm416_vm13, %vm968_vm5 }
  0xae   : > { %v348_v23 = vmul.f32 %v941_v41, %v339_v13  ;;  %v347_v43 = vmul.f32 %v941_v41, %v338_v32 }
  0xb0   : > { %v352_v39 = vrot.slane %v348_v23, 4 }
  0xb2   : > { %v950_v48 = vpop.permute.xlu0 %361  ;;  %v444_v16 = vpop.permute.xlu2 %443 }
  0xb3   : > { %v952_v49 = vpop.permute.xlu1 %377  ;;  %v366_v36 = vperm.slane %v950_v48, %v365_v28  ;;  %v353_v48 = vsel %vm256_vm0, %v347_v43, %v352_v39 }
  0xb4   : > { %v383_v24 = vsel %vm381_vm11, %v945_v46, %v952_v49  ;;  %v382_v44 = vsel %vm381_vm11, %v952_v49, %v945_v46 }
  0xb5   : > { %v385_v33 = vsel %vm968_vm5, %v383_v24, 0.0  ;;  %v368_v41 = vmul.f32 %v366_v36, %v888_v2  ;;  %v384_v62 = vsel %vm983_vm8, %v382_v44, 0.0  ;;  %v355_v2 = vadd.f32 %v353_v48, %v324_v61 }
  0xb7   : > { %v370_v6 = vadd.f32 %v368_v41, %v355_v2 }
  0xba   : > { %v411_v55 = vpop.permute.xlu0 %410  ;;  %v475_v46 = vpop.permute.xlu2 %474 }
  0xbb   : > { %v975_v58 = vpop.permute.xlu1 %390  ;;  %v414_v25 = vsel %vm412_vm12, %v411_v55, %v958_v52  ;;  %v413_v50 = vsel %vm412_vm12, %v958_v52, %v411_v55 }
  0xbc   : > { %v420_v35 = vsel %vm1039_vm15, %v414_v25, 0.0  ;;  %v394_v34 = vmul.f32 %v975_v58, %v385_v33  ;;  %v419_v49 = vsel %vm977_vm7, %v413_v50, 0.0  ;;  %v393_v55 = vmul.f32 %v975_v58, %v384_v62 }
  0xbe   : > { %v398_v57 = vrot.slane %v394_v34, 4 }
  0xc0   : > { %v399_v4 = vsel %vm256_vm0, %v393_v55, %v398_v57 }
  0xc1   : > { %v401_v9 = vadd.f32 %v399_v4, %v370_v6 }
  0xc2   : > { %v446_v21 = vpop.permute.xlu0 %445  ;;  %v513_v18 = vpop.permute.xlu2 %512 }
  0xc3   : > { %v426_v20 = vpop.permute.xlu1 %425  ;;  %v449_v30 = vsel %vm447_vm14, %v446_v21, %v444_v16  ;;  %v448_v3 = vsel %vm447_vm14, %v444_v16, %v446_v21 }
  0xc4   : > { %v451_v42 = vsel %vm416_vm13, %v449_v30, 0.0  ;;  %v429_v51 = vmul.f32 %v426_v20, %v420_v35  ;;  %v428_v59 = vmul.f32 %v426_v20, %v419_v49 }
  0xc6   : > { %v433_v0 = vrot.slane %v429_v51, 4 }
  0xc8   : > { %v434_v8 = vsel %vm256_vm0, %v428_v59, %v433_v0 }
  0xc9   : > { %v436_v13 = vadd.f32 %v434_v8, %v401_v9 }
  0xca   : > { %v477_v52 = vpop.permute.xlu0 %476  ;;  %v549_v34 = vpop.permute.xlu2 %548 }
  0xcb   : > { %v457_v54 = vpop.permute.xlu1 %456  ;;  %v480_v1 = vsel %vm478_vm1, %v477_v52, %v475_v46  ;;  %v479_v58 = vsel %vm478_vm1, %v475_v46, %v477_v52 }
  0xcc   : > { %v460_v60 = vmul.f32 %v457_v54, %v451_v42  ;;  %v484_v7 = vsel %vm482_vm2, %v480_v1, 0.0  ;;  %v459_v56 = vmul.f32 %v457_v54, %v448_v3  ;;  %v483_v10 = vsel %vm983_vm8, %v479_v58, 0.0 }
  0xce   : > { %v464_v5 = vrot.slane %v460_v60, 4 }
  0xd0   : > { %v465_v11 = vsel %vm256_vm0, %v459_v56, %v464_v5 }
  0xd1   : > { %v467_v16 = vadd.f32 %v465_v11, %v436_v13 }
  0xd2   : > { %v506_v19 = vpop.permute.xlu0 %505 }
  0xd3   : > { %v490_v47 = vpop.permute.xlu1 %489 }
  0xd4   : > { %v493_v12 = vmul.f32 %v490_v47, %v484_v7  ;;  %v492_v14 = vmul.f32 %v490_v47, %v483_v10 }
  0xd6   : > { %v497_v15 = vrot.slane %v493_v12, 4 }
  0xd8   : > { %v498_v45 = vsel %vm256_vm0, %v492_v14, %v497_v15 }
  0xd9   : > { %v500_v17 = vadd.f32 %v498_v45, %v467_v16 }
  0xda   : > { %v567_v44 = vpop.permute.xlu0 %566 }
  0xdb   : > { %501 = vst [vmem:[#allocation2] sm:$0xff] %v500_v17  ;;  %v531_v29 = vpop.permute.xlu1 %530 }
  0xe2   : > { %v509_v20 = vld [vmem:[#allocation2] ss:$4 sm:$0x3]  ;;  %v527_v21 = vld [vmem:[#allocation2 + $0x1] ss:$4 sm:$0x3] }
  0xe3   : > { %v516_v63 = vperm.slane %v509_v20, 0  ;;  %v517_v22 = vperm.slane %v509_v20, 1  ;;  %v534_v23 = vperm.slane %v527_v21, 0  ;;  %v535_v24 = vperm.slane %v527_v21, 1 }
  0xe4   : > { %v545_v25 = vld [vmem:[#allocation2 + $0x2] ss:$4 sm:$0x3]  ;;  %v563_v26 = vld [vmem:[#allocation2 + $0x3] ss:$4 sm:$0x3] }
  0xe5   : > { %v520_v27 = vmul.f32 %v516_v63, %v513_v18  ;;  %v521_v28 = vmul.f32 %v517_v22, %v513_v18  ;;  %v538_v30 = vmul.f32 %v534_v23, %v531_v29  ;;  %v539_v31 = vmul.f32 %v535_v24, %v531_v29 }
  0xe6   : > { %v552_v32 = vperm.slane %v545_v25, 0  ;;  %v553_v33 = vperm.slane %v545_v25, 1  ;;  %v570_v38 = vperm.slane %v563_v26, 0  ;;  %v571_v39 = vperm.slane %v563_v26, 1 }
  0xe7   : > { %v522_v35 = vadd.f32 %v520_v27, %v506_v19  ;;  %v523_v37 = vadd.f32 %v521_v28, %v506_v19 }
  0xe8   : > { %v556_v42 = vmul.f32 %v552_v32, %v549_v34  ;;  %v557_v43 = vmul.f32 %v553_v33, %v549_v34  ;;  %v574_v53 = vmul.f32 %v570_v38, %v567_v44  ;;  %v575_v54 = vmul.f32 %v571_v39, %v567_v44 }
  0xe9   : > { %v540_v40 = vadd.f32 %v538_v30, %v522_v35  ;;  %v541_v36 = vadd.f32 %v539_v31, %v523_v37 }
  0xeb   : > { %v558_v50 = vadd.f32 %v556_v42, %v540_v40  ;;  %v559_v51 = vadd.f32 %v557_v43, %v541_v36 }
  0xed   : > { %v576_v48 = vadd.f32 %v574_v53, %v558_v50  ;;  %v577_v57 = vadd.f32 %v575_v54, %v559_v51 }
  0xef   : > { %578 = vst [vmem:[%s190_s19] sm:$0xff] %v576_v48 }
  0xf0   : > { %579 = vst [vmem:[%s190_s19 + $0x8] sm:$0xff] %v577_v57 }
  0xf1   : > { %760 = shalt.err (!%p757_p3)
}
  0xf2   : > { %681 = dma.vmem_to_hbm [thread:$0]  (%p870_p5), %s595_s14, 256, %s597_s20, %s581_s22  }
  0xf3 PF: > { %p687_p4 = scmp.ge.s32.totalorder %s795_s18, 2  ;;  %s608_s7 = sand.u32 1, %s783_s15  }
  0xf4   : > { %s609_s8 = scalar_lea.sflag [#allocation4], %s608_s7 }
  0xf5   : > { %p684_p7 = pnand %p687_p4, %p874_p6 }
  0xf7   : > { %p685_p8 = pneg %p684_p7 }
  0xf9   : > { %778 = dma.done.wait (%p685_p8), %s609_s8, 256  }
  0xfa   : > { %780 = vsyncadd (%p685_p8), %s609_s8, 4294967040  ;;  %p14_p9 = scmp.ge.s32.totalorder %s857_s21, 4   ;;  %s1149_s15 = smov %s787_s16 }
  0xfb   : > { %s1150_s16 = smov %s791_s17  ;;  %s1151_s17 = smov %s868_s24 }
  0xfc   : > { %s1152_s18 = smov %s857_s21  ;;  %16 = sbr.rel (!%p14_p9) target bundleno = 3 (0x3), region = 85 }
 0x101   :  { %615 = vsyncpa [#allocation4], 1 }
 0x102   :  { %617 = vsyncpa [#allocation4 + $0x1], 1 }

</bundles_post_ra>
